<compile_context>
chip_gen: v5e
topology: v5e:2x2
jax: 0.10.0
libtpu: 0.0.40
codegen_flags: <defaults>
</compile_context>

<pallas_src>
import functools

import jax
import jax.numpy as jnp
from jax import lax
from jax.experimental import pallas as pl
from jax.experimental.pallas import tpu as pltpu


def qkv_proj_kernel(x_ref, w_ref, q_ref, k_ref, v_ref, *, head_size):
    # x_ref: (1, tp, C) bf16   w_ref: (C, 3H) bf16 = [Wq * C**-0.5 | Wk | Wv]
    # q_ref / k_ref / v_ref: (1, tp, H) bf16
    H = head_size
    y = jnp.dot(x_ref[0], w_ref[...], preferred_element_type=jnp.float32)
    q_ref[0] = y[:, :H].astype(q_ref.dtype)
    k_ref[0] = y[:, H:2 * H].astype(k_ref.dtype)
    v_ref[0] = y[:, 2 * H:].astype(v_ref.dtype)


def masked_attn_kernel(qi_tab_ref, kv_tab_ref, q_ref, k_ref, v_ref, o_ref,
                       m_sc, l_sc, acc_sc):
    # q_ref: (1, tq, H) bf16 (pre-scaled)   k_ref/v_ref: (1, tk, H) bf16
    # o_ref: (1, tq, H) f32
    # m_sc/l_sc: (tq, 1) f32   acc_sc: (tq, H) f32
    p_idx = pl.program_id(1)
    qi = qi_tab_ref[p_idx]
    kv = kv_tab_ref[p_idx]
    tq = q_ref.shape[1]
    tk = k_ref.shape[1]

    @pl.when(kv == 0)
    def _init():
        m_sc[...] = jnp.full_like(m_sc, -jnp.inf)
        l_sc[...] = jnp.zeros_like(l_sc)
        acc_sc[...] = jnp.zeros_like(acc_sc)

    # scores: contract the head dim of q and k directly (no transpose of k).
    s = lax.dot_general(q_ref[0], k_ref[0],
                        dimension_numbers=(((1,), (1,)), ((), ())),
                        preferred_element_type=jnp.float32)     # (tq, tk) f32

    def online_softmax_update(s_val):
        m_prev = m_sc[...]
        m_new = jnp.maximum(m_prev, jnp.max(s_val, axis=-1, keepdims=True))
        alpha = jnp.exp(m_prev - m_new)
        p = jnp.exp(s_val - m_new)
        l_sc[...] = alpha * l_sc[...] + jnp.sum(p, axis=-1, keepdims=True)
        acc_sc[...] = alpha * acc_sc[...] + jnp.dot(
            p.astype(jnp.bfloat16), v_ref[0], preferred_element_type=jnp.float32)
        m_sc[...] = m_new

    # Strictly sub-diagonal tiles are fully unmasked: no mask work at all.
    @pl.when(kv < qi)
    def _off_diagonal():
        online_softmax_update(s)

    # Diagonal tile: apply the tile-local causal mask (qi == kv and tq == tk,
    # so local col<=row equals the global condition), then finalize -- under
    # causal masking this is always the last KV tile for this query tile.
    @pl.when(kv == qi)
    def _diagonal_and_finalize():
        row = lax.broadcasted_iota(jnp.int32, (tq, tk), 0)
        col = lax.broadcasted_iota(jnp.int32, (tq, tk), 1)
        # Large finite negative: every row keeps its diagonal entry, so the
        # running max and denominator stay finite.
        online_softmax_update(jnp.where(col <= row, s, jnp.float32(-1e30)))
        inv = pl.reciprocal(l_sc[...], approx=True)
        o_ref[0] = (acc_sc[...] * inv).astype(o_ref.dtype)


def masked_head(x, w_key, w_query, w_value, *, tq=None, tk=None, tp=None):
    """x: (B, T, C) f32.  w_*: (head_size, C) as stored by nn.Linear (no bias)."""
    B, T, C = x.shape
    H = w_key.shape[0]
    scale = float(C) ** -0.5

    if tq is None:
        tq = T if T <= 128 else 128
    if tk is None:
        tk = tq
    if tp is None:
        tp = T if T <= 256 else 256
    assert T % tq == 0 and T % tk == 0 and T % tp == 0, "T must tile evenly"
    assert tq == tk, "causal diagonal-tile logic assumes square attention tiles"

    x_bf = x.astype(jnp.bfloat16)
    # [Wq * C**-0.5 | Wk | Wv]: fold the score scale into the Q projection.
    w_packed = jnp.concatenate(
        [w_query.T * jnp.float32(scale), w_key.T, w_value.T], axis=1
    ).astype(jnp.bfloat16)                                           # (C, 3H)

    # ---- one-shot Q/K/V projection (hoisted out of the attention loop) ----
    q, k, v = pl.pallas_call(
        functools.partial(qkv_proj_kernel, head_size=H),
        out_shape=(
            jax.ShapeDtypeStruct((B, T, H), jnp.bfloat16),
            jax.ShapeDtypeStruct((B, T, H), jnp.bfloat16),
            jax.ShapeDtypeStruct((B, T, H), jnp.bfloat16),
        ),
        grid_spec=pltpu.PrefetchScalarGridSpec(
            num_scalar_prefetch=0,
            grid=(B, T // tp),
            in_specs=[
                pl.BlockSpec((1, tp, C), lambda b, i: (b, i, 0)),    # x tile
                pl.BlockSpec((C, 3 * H), lambda b, i: (0, 0)),       # packed W
            ],
            out_specs=[
                pl.BlockSpec((1, tp, H), lambda b, i: (b, i, 0)),
                pl.BlockSpec((1, tp, H), lambda b, i: (b, i, 0)),
                pl.BlockSpec((1, tp, H), lambda b, i: (b, i, 0)),
            ],
        ),
        compiler_params=pltpu.CompilerParams(
            dimension_semantics=("parallel", "parallel"),
            vmem_limit_bytes=32 * 1024 * 1024,
        ),
    )(x_bf, w_packed)

    # ---- flash attention over the lower-triangular (qi, kv) tile pairs ----
    nq = T // tq
    pairs = [(i, j) for i in range(nq) for j in range(i + 1)]
    qi_tab = jnp.asarray([p[0] for p in pairs], dtype=jnp.int32)
    kv_tab = jnp.asarray([p[1] for p in pairs], dtype=jnp.int32)
    n_pairs = len(pairs)

    grid_spec = pltpu.PrefetchScalarGridSpec(
        num_scalar_prefetch=2,
        grid=(B, n_pairs),
        in_specs=[
            pl.BlockSpec((1, tq, H), lambda b, p, qi_t, kv_t: (b, qi_t[p], 0)),
            pl.BlockSpec((1, tk, H), lambda b, p, qi_t, kv_t: (b, kv_t[p], 0)),
            pl.BlockSpec((1, tk, H), lambda b, p, qi_t, kv_t: (b, kv_t[p], 0)),
        ],
        out_specs=pl.BlockSpec(
            (1, tq, H), lambda b, p, qi_t, kv_t: (b, qi_t[p], 0)),
        scratch_shapes=[
            pltpu.VMEM((tq, 1), jnp.float32),    # running max m
            pltpu.VMEM((tq, 1), jnp.float32),    # running denom l
            pltpu.VMEM((tq, H), jnp.float32),    # output accumulator
        ],
    )

    return pl.pallas_call(
        masked_attn_kernel,
        out_shape=jax.ShapeDtypeStruct((B, T, H), jnp.float32),
        grid_spec=grid_spec,
        compiler_params=pltpu.CompilerParams(
            dimension_semantics=("parallel", "arbitrary"),
            vmem_limit_bytes=32 * 1024 * 1024,
        ),
    )(qi_tab, kv_tab, q, k, v)


def masked_head_ref(x, w_key, w_query, w_value):
    """Pure-JAX f32 reference mirroring the PyTorch forward (eval mode)."""
    B, T, C = x.shape
    k = x @ w_key.T
    q = x @ w_query.T
    v = x @ w_value.T
    wei = (q @ jnp.swapaxes(k, -2, -1)) * (C ** -0.5)
    tril = jnp.tril(jnp.ones((T, T), dtype=bool))
    wei = jnp.where(tril, wei, -jnp.inf)
    wei = jax.nn.softmax(wei, axis=-1)
    return wei @ v


def _make_inputs(key, B, T, n_embd, head_size):
    kx, kk, kq, kv = jax.random.split(key, 4)
    x = jax.random.normal(kx, (B, T, n_embd), dtype=jnp.float32)
    bound = 1.0 / (n_embd ** 0.5)
    w_key = jax.random.uniform(kk, (head_size, n_embd), jnp.float32, -bound, bound)
    w_query = jax.random.uniform(kq, (head_size, n_embd), jnp.float32, -bound, bound)
    w_value = jax.random.uniform(kv, (head_size, n_embd), jnp.float32, -bound, bound)
    return x, w_key, w_query, w_value


if __name__ == "__main__":
    key = jax.random.PRNGKey(0)
    k1, k2 = jax.random.split(key)

    # Test 1: module-consistent small shapes (single tile per batch element).
    B, T, n_embd, head_size = 2, 8, 32, 16
    x, wk_, wq_, wv_ = _make_inputs(k1, B, T, n_embd, head_size)
    out = jax.block_until_ready(masked_head(x, wk_, wq_, wv_))
    ref = masked_head_ref(x, wk_, wq_, wv_)
    assert out.shape == (B, T, head_size)
    assert jnp.allclose(out, ref, atol=5e-2, rtol=5e-2), "mismatch vs reference (T=8)"

    # Test 2: exercise the triangular flash grid (multiple q/kv/proj tiles).
    B2, T2 = 2, 64
    x2, wk2, wq2, wv2 = _make_inputs(k2, B2, T2, n_embd, head_size)
    out2 = jax.block_until_ready(
        masked_head(x2, wk2, wq2, wv2, tq=16, tk=16, tp=32))
    ref2 = masked_head_ref(x2, wk2, wq2, wv2)
    assert out2.shape == (B2, T2, head_size)
    assert jnp.allclose(out2, ref2, atol=5e-2, rtol=5e-2), "mismatch vs reference (T=64)"

    print("KERNEL_OK")
</pallas_src>

<mosaic_0001>
module attributes {stable_mosaic.version = 11 : i64} {
  func.func @qkv_proj_kernel(%arg0: i32, %arg1: i32, %arg2: memref<1x8x32xbf16, #tpu.memory_space<vmem>>, %arg3: memref<32x48xbf16, #tpu.memory_space<vmem>>, %arg4: memref<1x8x16xbf16, #tpu.memory_space<vmem>>, %arg5: memref<1x8x16xbf16, #tpu.memory_space<vmem>>, %arg6: memref<1x8x16xbf16, #tpu.memory_space<vmem>>) attributes {dimension_semantics = [#tpu.dimension_semantics<parallel>, #tpu.dimension_semantics<parallel>], iteration_bounds = array<i64: 2, 1>, scalar_prefetch = 0 : i64, scratch_operands = 0 : i64, tpu.core_type = #tpu.core_type<tc>, window_params = [{transform_indices = @transform_0, window_bounds = array<i64: 1, 8, 32>}, {pipeline_mode = #tpu.pipeline_mode<synchronous>, transform_indices = @transform_1, window_bounds = array<i64: 32, 48>}, {transform_indices = @transform_2, window_bounds = array<i64: 1, 8, 16>}, {transform_indices = @transform_3, window_bounds = array<i64: 1, 8, 16>}, {transform_indices = @transform_4, window_bounds = array<i64: 1, 8, 16>}]} {
    %c0 = arith.constant 0 : index
    %c0_0 = arith.constant 0 : index
    %c0_1 = arith.constant 0 : index
    %0 = vector.load %arg2[%c0, %c0_0, %c0_1] : memref<1x8x32xbf16, #tpu.memory_space<vmem>>, vector<1x8x32xbf16>
    %1 = vector.shape_cast %0 : vector<1x8x32xbf16> to vector<8x32xbf16>
    %c0_2 = arith.constant 0 : index
    %c0_3 = arith.constant 0 : index
    %2 = vector.load %arg3[%c0_2, %c0_3] : memref<32x48xbf16, #tpu.memory_space<vmem>>, vector<32x48xbf16>
    %cst = arith.constant dense<0.000000e+00> : vector<8x48xf32>
    %3 = tpu.matmul %1, %2, %cst {dimension_numbers = #tpu.dot_dimension_numbers<[1], [0], [0], [1], [0, 0, 1, 1], [], []>} : vector<8x32xbf16>, vector<32x48xbf16>, vector<8x48xf32> -> vector<8x48xf32>
    %4 = vector.extract_strided_slice %3 {offsets = [0, 0], sizes = [8, 16], strides = [1, 1]} : vector<8x48xf32> to vector<8x16xf32>
    %5 = arith.truncf %4 : vector<8x16xf32> to vector<8x16xbf16>
    %c0_4 = arith.constant 0 : index
    %c0_5 = arith.constant 0 : index
    %c0_6 = arith.constant 0 : index
    %6 = vector.load %arg4[%c0_4, %c0_5, %c0_6] : memref<1x8x16xbf16, #tpu.memory_space<vmem>>, vector<1x8x16xbf16>
    %7 = vector.shape_cast %6 : vector<1x8x16xbf16> to vector<8x16xbf16>
    %8 = vector.shape_cast %5 : vector<8x16xbf16> to vector<1x8x16xbf16>
    tpu.vector_store %arg4[%c0_4, %c0_5, %c0_6], %8 {strides = array<i32>} : memref<1x8x16xbf16, #tpu.memory_space<vmem>>, vector<1x8x16xbf16>,
    %9 = vector.extract_strided_slice %3 {offsets = [0, 16], sizes = [8, 16], strides = [1, 1]} : vector<8x48xf32> to vector<8x16xf32>
    %10 = arith.truncf %9 : vector<8x16xf32> to vector<8x16xbf16>
    %c0_7 = arith.constant 0 : index
    %c0_8 = arith.constant 0 : index
    %c0_9 = arith.constant 0 : index
    %11 = vector.load %arg5[%c0_7, %c0_8, %c0_9] : memref<1x8x16xbf16, #tpu.memory_space<vmem>>, vector<1x8x16xbf16>
    %12 = vector.shape_cast %11 : vector<1x8x16xbf16> to vector<8x16xbf16>
    %13 = vector.shape_cast %10 : vector<8x16xbf16> to vector<1x8x16xbf16>
    tpu.vector_store %arg5[%c0_7, %c0_8, %c0_9], %13 {strides = array<i32>} : memref<1x8x16xbf16, #tpu.memory_space<vmem>>, vector<1x8x16xbf16>,
    %14 = vector.extract_strided_slice %3 {offsets = [0, 32], sizes = [8, 16], strides = [1, 1]} : vector<8x48xf32> to vector<8x16xf32>
    %15 = arith.truncf %14 : vector<8x16xf32> to vector<8x16xbf16>
    %c0_10 = arith.constant 0 : index
    %c0_11 = arith.constant 0 : index
    %c0_12 = arith.constant 0 : index
    %16 = vector.load %arg6[%c0_10, %c0_11, %c0_12] : memref<1x8x16xbf16, #tpu.memory_space<vmem>>, vector<1x8x16xbf16>
    %17 = vector.shape_cast %16 : vector<1x8x16xbf16> to vector<8x16xbf16>
    %18 = vector.shape_cast %15 : vector<8x16xbf16> to vector<1x8x16xbf16>
    tpu.vector_store %arg6[%c0_10, %c0_11, %c0_12], %18 {strides = array<i32>} : memref<1x8x16xbf16, #tpu.memory_space<vmem>>, vector<1x8x16xbf16>,
    return
  }
  func.func @transform_0(%arg0: i32, %arg1: i32) -> (i32, i32, i32) {
    %c0_i32 = arith.constant 0 : i32
    %c0_i32_0 = arith.constant 0 : i32
    return %arg0, %arg1, %c0_i32 : i32, i32, i32
  }
  func.func @transform_1(%arg0: i32, %arg1: i32) -> (i32, i32) {
    %c0_i32 = arith.constant 0 : i32
    %c0_i32_0 = arith.constant 0 : i32
    %c0_i32_1 = arith.constant 0 : i32
    return %c0_i32, %c0_i32_0 : i32, i32
  }
  func.func @transform_2(%arg0: i32, %arg1: i32) -> (i32, i32, i32) {
    %c0_i32 = arith.constant 0 : i32
    %c0_i32_0 = arith.constant 0 : i32
    return %arg0, %arg1, %c0_i32 : i32, i32, i32
  }
  func.func @transform_3(%arg0: i32, %arg1: i32) -> (i32, i32, i32) {
    %c0_i32 = arith.constant 0 : i32
    %c0_i32_0 = arith.constant 0 : i32
    return %arg0, %arg1, %c0_i32 : i32, i32, i32
  }
  func.func @transform_4(%arg0: i32, %arg1: i32) -> (i32, i32, i32) {
    %c0_i32 = arith.constant 0 : i32
    %c0_i32_0 = arith.constant 0 : i32
    return %arg0, %arg1, %c0_i32 : i32, i32, i32
  }
}

</mosaic_0001>

<bundles_post_ra>
// kernel: tpu_custom_call.1
= control target key start
LH: loop header
LB: loop body
LE: loop exit
PB: predicated region body
PF: predicated region fallthrough
CT: control target
= control target key end

     0   :  { %10 = vsyncpa [#allocation3], 0  ;;  %s1079_s0 = inlined_call_operand.hbm [shape: bf16[2,8,32], index: 0, kind: input, shape index: {}]   ;;  %s1080_s1 = inlined_call_operand.hbm [shape: bf16[32,48], index: 1, kind: input, shape index: {}]   ;;  %s1081_s2 = inlined_call_operand.hbm [shape: bf16[2,8,16], index: 2, kind: output, shape index: {0}]   ;;  %s1082_s3 = inlined_call_operand.hbm [shape: bf16[2,8,16], index: 3, kind: output, shape index: {1}]   ;;  %s1083_s4 = inlined_call_operand.hbm [shape: bf16[2,8,16], index: 4, kind: output, shape index: {2}]  }
   0x1   :  { %12 = vsyncpa [#allocation3 + $0x1], 0 }
   0x2   :  { %13 = vsyncpa [#allocation6], 0 }
   0x3   :  { %14 = vsyncpa [#allocation4], 0 }
   0x4   :  { %16 = vsyncpa [#allocation4 + $0x1], 0 }
   0x5   :  { %17 = vsyncpa [#allocation9], 0 }
   0x6   :  { %19 = vsyncpa [#allocation9 + $0x1], 0  ;;  %s887_s15 = smov 0   ;;  %s889_s16 = smov 0  }
   0x7   :  { %s891_s17 = smov 0   ;;  %s893_s18 = smov 0  }
   0x8   :  { %s895_s19 = smov 0   ;;  %s897_s20 = smov 0  }
   0x9 LB: > { %s918_s21 = sadd.s32 4294967295, %s855_s20   ;;  %p532_p0 = scmp.ge.s32.totalorder %s855_s20, 1  ;;  %s855_s20 = sphi %s897_s20, %s25_s20   ;;  %s851_s19 = sphi %s895_s19, %s1095_s19   ;;  %s847_s18 = sphi %s893_s18, %s1094_s18   ;;  %s843_s17 = sphi %s891_s17, %s1093_s17   ;;  %s839_s16 = sphi %s889_s16, %s1092_s16   ;;  %s835_s15 = sphi %s887_s15, %s1091_s15  }
   0xa   : > { %p60_p1 = scmp.eq.s32.totalorder %s918_s21, 0  ;;  %p175_p2 = scmp.lt.s32.totalorder %s855_s20, 3 }
   0xb   : > { %s186_s24 = sshll.u32 %s1080_s1, 4  ;;  %s857_s26 = smov [#allocation5]   ;;  %s187_s24 = int_to_ptr.hbm [resolvable:$true] %s186_s24 }
   0xc   : > { %p926_p3 = pnand %p532_p0, %p175_p2  ;;  %s188_s27 = sshll.u32 %s857_s26, 4  ;;  %s189_s27 = int_to_ptr.vmem [resolvable:$true] %s188_s27 }
   0xd   : > { %p534_p6 = scmp.ge.s32.totalorder %s855_s20, 2  ;;  %s858_s28 = smov 64  }
   0xe   : > { %p574_p4 = pneg %p926_p3  ;;  %s859_s29 = smov 4  }
   0xf   : > { %s1084_s30 = sadd.s32 4294967294, %s855_s20   ;;  %s37_s5 = sadd.s32 1, %s851_s19 }
  0x10   : > { %p575_p5 = pnand %p574_p4, %p60_p1  ;;  %s46_s6 = sadd.s32 1, %s843_s17 }
  0x11   : > { %p39_p7 = scmp.ge.s32.totalorder %s37_s5, 2  ;;  %p53_p8 = scmp.ne.s32.totalorder %s843_s17, %s839_s16 }
  0x12   : > { %577 = dma.hbm_to_vmem [thread:$0]  (!%p575_p5), %s187_s24, 256, %s189_s27, [#allocation6], %s858_s28, %s858_s28, %s859_s29  }
  0x13   : > { %p54_p9 = scmp.eq.s32.totalorder %s855_s20, 0  ;;  %p59_p10 = scmp.ne.s32.totalorder %s839_s16, %s835_s15 }
  0x14   : > { %s1097_s5 = smov (%p39_p7, %s37_s5), 0  ;;  %p106_p13 = scmp.eq.s32.totalorder %s918_s21, 1 }
  0x15   : > { %p945_p11 = por %p54_p9, %p53_p8  ;;  %p951_p12 = por %p60_p1, %p59_p10 }
  0x16   : > { %s41_s9 = ssub.s32 %s851_s19, %s1097_s5  ;;  %p112_p2 = scmp.eq.s32.totalorder %s1084_s30, 1 }
  0x17   : > { %p44_p0 = scmp.eq.s32.totalorder %s41_s9, 0  ;;  %p960_p4 = por %p106_p13, %p53_p8 }
  0x18   : > { %p593_p5 = scmp.lt.s32.totalorder %s855_s20, 2  ;;  %p968_p7 = por %p112_p2, %p59_p10 }
  0x19   : > { %s966_s11 = scalar_select %p44_p0, %s843_s17, %s46_s6  }
  0x1a   : > { %s202_s13 = sand.u32 1, %s843_s17   ;;  %s536_s22 = sshll.u32 %s851_s19, 2 }
  0x1b   : > { %s535_s14 = sshll.u32 %s202_s13, 2  ;;  %s211_s26 = scalar_lea.hbm %s1079_s0, %s536_s22 }
  0x1c   : > { %s206_s27 = scalar_lea.vmem [#allocation2], %s535_s14  ;;  %s213_s29 = sshll.u32 %s211_s26, 4  ;;  %s214_s29 = int_to_ptr.hbm [resolvable:$true] %s213_s29 }
  0x1d   : > { %s215_s28 = sshll.u32 %s206_s27, 4  ;;  %p579_p8 = pnand %p593_p5, %p945_p11  ;;  %s216_s28 = int_to_ptr.vmem [resolvable:$true] %s215_s28 }
  0x1e   : > { %s203_s6 = scalar_lea.sflag [#allocation3], %s202_s13  ;;  %224 = sbr.rel (%p926_p3) target bundleno = 305 (0x131), region = 28 }
  0x1f   : > { %581 = dma.hbm_to_vmem [thread:$0]  (!%p579_p8), %s214_s29, 64, %s216_s28, %s203_s6  }
  0x20   : > { %s982_s9 = sand.u32 (!%p926_p3), 1, %s839_s16  }
  0x21   : > { %s985_s23 = sshll.u32 (!%p926_p3), %s982_s9, 2  ;;  %s227_s14 = scalar_lea.sflag (!%p926_p3), [#allocation3], %s982_s9 }
  0x22   : > { %s230_s22 = scalar_lea.vmem (!%p926_p3), [#allocation2], %s985_s23 }
  0x23   : > { %818 = dma.done.wait (%p951_p12), %s227_s14, 64  }
  0x24   : > { %820 = vsyncadd (%p951_p12), %s227_s14, 4294967232 }
  0x25   : > { %822 = dma.done.wait (%p60_p1), [#allocation6], 256  }
  0x26   : > { %824 = vsyncadd (%p60_p1), [#allocation6], 4294967040  ;;  %v561_v0 = vld [vmem:[#allocation5 + $0x8] sm:$0xff]  ;;  %v560_v1 = vld [vmem:[#allocation5] sm:$0xff]  ;;  %vm289_vm0 = vcmask 261120   ;;  %s998_s25 = sshll.u32 %s847_s18, 2 }
  0x27   : > { %299 = vmatpush.bf16.msra.mxu0 %v561_v0  ;;  %v272_v2 = vld [vmem:[%s230_s22] sm:$0xf]  ;;  %s340_s13 = scalar_lea.hbm %s1081_s2, %s998_s25  ;;  %vm307_vm1 = vcmask 125952   ;;  %s256_s24 = scalar_lea.vmem [#allocation7], %s985_s23 }
  0x28   : > { %s342_s26 = sshll.u32 %s256_s24, 4  ;;  %s344_s27 = sshll.u32 %s340_s13, 4  ;;  %s343_s26 = int_to_ptr.vmem [resolvable:$true] %s342_s26  ;;  %s345_s27 = int_to_ptr.hbm [resolvable:$true] %s344_s27 }
  0x29   : > { %s860_s28 = smov 112   ;;  %s319_s18 = scalar_lea.sflag [#allocation4], %s982_s9 }
  0x2a   : > { %s723_s29 = sshra.s32 %s345_s27, 4  ;;  %s729_s7 = scalar_lea.hbm %s1081_s2, 8  ;;  %s724_s29 = int_to_ptr.hbm [resolvable:$true] %s723_s29 }
  0x2b   : > { %300 = vmatpush.bf16.msra.mxu0 %v560_v1  ;;  %s725_s6 = scalar_lea.hbm %s724_s29, 4  ;;  %p730_p10 = scmp.lt.s32.totalorder %s724_s29, %s1081_s2 }
  0x2c   : > { %p726_p1 = scmp.ne.s32.totalorder %s724_s29, %s725_s6  ;;  %p731_p11 = scmp.lt.s32.totalorder %s729_s7, %s725_s6 }
  0x2e   : > { %551 = vmatmul.msk.bf16.vlgmr.msra.gmra.mxu0 %vm289_vm0, %v272_v2  ;;  %p727_p3 = pnand %p726_p1, %p960_p4  ;;  %p732_p12 = por %p731_p11, %p730_p10 }
  0x30   : > { %p728_p9 = pneg %p727_p3 }
  0x32   : > { %p733_p13 = pnand %p732_p12, %p728_p9 }
  0xab   : > { %v302_v3 = vpop.f32.mrf.mxu0 }
  0xac   : > { %v306_v4 = vpack.c.bf16 %v302_v3, %v302_v3 }
  0xae   : > { %310 = vrot.lane.b32.xlu0 %v306_v4, %s860_s28  ;;  %308 = vst.msk [vmem:[%s256_s24] sm:$0xf] %vm307_vm1, %v306_v4 }
  0xaf   : > { %736 = shalt.err (!%p733_p13)
}
  0xb0   : > { %568 = dma.vmem_to_hbm [thread:$0]  (%p960_p4), %s343_s26, 64, %s345_s27, %s319_s18  }
  0xb1   : > { %s861_s9 = smov 96   ;;  %s355_s14 = scalar_lea.hbm %s1082_s3, %s998_s25 }
  0xb2   : > { %s323_s29 = sand.u32 1, %s918_s21   ;;  %s263_s6 = scalar_lea.vmem [#allocation8], %s985_s23 }
  0xb3   : > { %v304_v5 = vpop.f32.mrf.mxu0  ;;  %s357_s22 = sshll.u32 %s263_s6, 4  ;;  %s359_s7 = sshll.u32 %s355_s14, 4  ;;  %s358_s22 = int_to_ptr.vmem [resolvable:$true] %s357_s22  ;;  %s360_s7 = int_to_ptr.hbm [resolvable:$true] %s359_s7 }
  0xb4   : > { %s370_s26 = scalar_lea.hbm %s1083_s4, %s998_s25  ;;  %s1028_s27 = scalar_lea.sflag [#allocation9], %s323_s29 }
  0xb5   : > { %s751_s18 = sshra.s32 %s360_s7, 4  ;;  %s757_s28 = scalar_lea.hbm %s1082_s3, 8  ;;  %s752_s18 = int_to_ptr.hbm [resolvable:$true] %s751_s18 }
  0xb6   : > { %314 = vrot.lane.b32.xlu0 %v306_v4, %s861_s9  ;;  %s753_s9 = scalar_lea.hbm %s752_s18, 4  ;;  %p758_p8 = scmp.lt.s32.totalorder %s752_s18, %s1082_s3 }
  0xb7   : > { %p754_p0 = scmp.ne.s32.totalorder %s752_s18, %s753_s9  ;;  %p759_p1 = scmp.lt.s32.totalorder %s757_s28, %s753_s9 }
  0xb9   : > { %p755_p2 = pnand %p754_p0, %p960_p4  ;;  %p760_p3 = por %p759_p1, %p758_p8 }
  0xbb   : > { %p756_p5 = pneg %p755_p2 }
  0xbd   : > { %p761_p9 = pnand %p760_p3, %p756_p5 }
 0x120   : > { %v311_v6 = vpop.permute.xlu0 %310 }
 0x121   : > { %313 = vst.msk [vmem:[%s263_s6] sm:$0xf] %vm307_vm1, %v311_v6 }
 0x122   : > { %764 = shalt.err (!%p761_p9)
}
 0x123   : > { %569 = dma.vmem_to_hbm [thread:$0]  (%p960_p4), %s358_s22, 64, %s360_s7, %s1028_s27  }
 0x124   : > { %s270_s25 = scalar_lea.vmem [#allocation10], %s985_s23  ;;  %s374_s6 = sshll.u32 %s370_s26, 4  ;;  %s375_s6 = int_to_ptr.hbm [resolvable:$true] %s374_s6 }
 0x125   : > { %s372_s29 = sshll.u32 %s270_s25, 4  ;;  %s779_s30 = sshra.s32 %s375_s6, 4  ;;  %s373_s29 = int_to_ptr.vmem [resolvable:$true] %s372_s29  ;;  %s780_s30 = int_to_ptr.hbm [resolvable:$true] %s779_s30 }
 0x126   : > { %s781_s8 = scalar_lea.hbm %s780_s30, 4  ;;  %s785_s9 = scalar_lea.hbm %s1083_s4, 8 }
 0x127   : > { %p782_p10 = scmp.ne.s32.totalorder %s780_s30, %s781_s8  ;;  %p786_p13 = scmp.lt.s32.totalorder %s780_s30, %s1083_s4 }
 0x128   : > { %v315_v7 = vpop.permute.xlu0 %314  ;;  %p787_p0 = scmp.lt.s32.totalorder %s785_s9, %s781_s8 }
 0x129   : > { %317 = vst.msk [vmem:[%s270_s25] sm:$0xf] %vm307_vm1, %v315_v7  ;;  %p783_p11 = pnand %p782_p10, %p960_p4 }
 0x12a   : > { %p788_p2 = por %p787_p0, %p786_p13 }
 0x12b   : > { %p784_p12 = pneg %p783_p11 }
 0x12d   : > { %p789_p5 = pnand %p788_p2, %p784_p12 }
 0x12f   : > { %792 = shalt.err (!%p789_p5)
}
 0x130   : > { %570 = dma.vmem_to_hbm [thread:$0]  (%p960_p4), %s373_s29, 64, %s375_s6, %s1028_s27  }
 0x131 PF: > { %s386_s7 = sand.u32 1, %s835_s15   ;;  %p583_p8 = pnand %p534_p6, %p968_p7 }
 0x132   : > { %s387_s26 = scalar_lea.sflag [#allocation4], %s386_s7 }
 0x133   : > { %p584_p1 = pneg %p583_p8 }
 0x135   : > { %826 = dma.done.wait (%p584_p1), %s387_s26, 64  }
 0x136   : > { %828 = vsyncadd (%p584_p1), %s387_s26, 4294967232  ;;  %s1090_s21 = sadd.s32 4294967294, %s855_s20  }
 0x137   : > { %s396_s24 = sand.u32 1, %s1090_s21  }
 0x138   : > { %s397_s28 = scalar_lea.sflag [#allocation9], %s396_s24 }
 0x139   : > { %830 = dma.done.wait (%p584_p1), %s397_s28, 128  }
 0x13a   : > { %832 = vsyncadd (%p584_p1), %s397_s28, 4294967168  ;;  %s25_s20 = sadd.s32 1, %s855_s20   ;;  %s1091_s15 = smov %s839_s16 }
 0x13b   : > { %p22_p4 = scmp.ge.s32.totalorder %s25_s20, 4   ;;  %s1092_s16 = smov %s843_s17 }
 0x13c   : > { %s1093_s17 = smov %s966_s11  ;;  %s1094_s18 = smov %s851_s19 }
 0x13d   : > { %s1095_s19 = smov %s1097_s5  ;;  %24 = sbr.rel (!%p22_p4) target bundleno = 9 (0x9), region = 109 }
 0x142   :  { %413 = vsyncpa [#allocation3], 1 }
 0x143   :  { %415 = vsyncpa [#allocation3 + $0x1], 1 }
 0x144   :  { %416 = vsyncpa [#allocation6], 1 }
 0x145   :  { %417 = vsyncpa [#allocation4], 1 }
 0x146   :  { %419 = vsyncpa [#allocation4 + $0x1], 1 }
 0x147   :  { %420 = vsyncpa [#allocation9], 1 }
 0x148   :  { %422 = vsyncpa [#allocation9 + $0x1], 1 }

</bundles_post_ra>
